<compile_context>
chip_gen: v7x
topology: tpu7x:2x2x1
jax: 0.10.0
libtpu: 0.0.40
codegen_flags: <defaults>
</compile_context>

<pallas_src>
import functools

import jax
import jax.numpy as jnp
from jax.experimental import pallas as pl
from jax.experimental.pallas import tpu as pltpu


def _leaky_relu(v, slope=0.2):
    return jnp.where(v >= 0, v, slope * v)


def vae_kernel(
    # inputs (feature-major: [features, batch_tile])
    x_ref, eps_ref,
    w_in_ref, b_in_ref, w_in2_ref, b_in2_ref,
    w_mv_ref, b_mv_ref,
    w_h_ref, b_h_ref, w_h2_ref, b_h2_ref, w_out_ref, b_out_ref,
    # outputs
    xhat_ref, stats_ref,
    *, latent_dim,
):
    """One grid step = one batch tile; all activations stay resident in VMEM."""

    def dense(w_ref, a, b_ref):
        # (out, in)_bf16 @ (in, tb)_bf16 -> f32 accumulation on the MXU;
        # the bias add stays f32 on the VPU.
        return (
            jnp.dot(w_ref[...], a.astype(jnp.bfloat16),
                    preferred_element_type=jnp.float32)
            + b_ref[...]
        )

    x = x_ref[...]                                   # (input_dim, tb) f32

    # ---- Encoder ----
    h = _leaky_relu(dense(w_in_ref, x, b_in_ref))
    h = _leaky_relu(dense(w_in2_ref, h, b_in2_ref))

    # ---- Fused mean || log_var projection: one (2*latent, hidden) matmul ----
    stats = dense(w_mv_ref, h, b_mv_ref)             # (2*latent, tb)
    mean = stats[:latent_dim, :]                     # sublane-aligned split (row 16)
    log_var = stats[latent_dim:, :]

    # ---- Reparameterization: z = mean + exp(0.5 * log_var) * eps ----
    z = mean + jnp.exp(0.5 * log_var) * eps_ref[...]

    # ---- Decoder ----
    d = _leaky_relu(dense(w_h_ref, z, b_h_ref))
    d = _leaky_relu(dense(w_h2_ref, d, b_h2_ref))
    logits = dense(w_out_ref, d, b_out_ref)

    xhat_ref[...] = jax.nn.sigmoid(logits).astype(xhat_ref.dtype)
    stats_ref[...] = stats.astype(stats_ref.dtype)   # lane-dense mean||log_var


def _num_parallel_cores():
    """Best-effort TensorCore count per Pallas device (perf-only decision)."""
    try:
        kind = jax.devices()[0].device_kind.lower()
    except Exception:
        return 1
    for tag in ("v7", "v4", "v5p"):   # 2 TCs share one device / megacore
        if tag in kind:
            return 2
    return 1


def _choose_batch_tile(B, num_cores):
    """Batch tile along the 128-lane axis.

    Single grid step on 1-TC chips (each extra step costs ~0.35us of pipeline
    overhead); split across cores only when every tile stays a multiple of
    128 lanes so stores remain unmasked.
    """
    if num_cores > 1 and B % num_cores == 0:
        tb = B // num_cores
        if tb % 128 == 0:
            return tb
    return B


def pack_params(params, weight_dtype=jnp.bfloat16):
    """One-time prep, hoisted out of the per-call path:
      * weights transposed to (out, in) so the kernel computes W @ X,
      * weights cast to bf16 (true bf16 x bf16 MXU matmuls, f32 accumulation),
      * mean/var projections fused into one (2*latent, hidden) weight,
      * biases reshaped to (out, 1) f32 to broadcast over the batch-lane axis.
    """
    def w(a):
        return a.T.astype(weight_dtype)

    def b(a):
        return a.reshape(-1, 1).astype(jnp.float32)

    w_mv = jnp.concatenate([params["w_mean"], params["w_var"]], axis=1)
    b_mv = jnp.concatenate([params["b_mean"], params["b_var"]], axis=1)
    return {
        "w_in": w(params["w_in"]), "b_in": b(params["b_in"]),
        "w_in2": w(params["w_in2"]), "b_in2": b(params["b_in2"]),
        "w_mv": w(w_mv), "b_mv": b(b_mv),
        "w_h": w(params["w_h"]), "b_h": b(params["b_h"]),
        "w_h2": w(params["w_h2"]), "b_h2": b(params["b_h2"]),
        "w_out": w(params["w_out"]), "b_out": b(params["b_out"]),
    }


@functools.partial(jax.jit, static_argnames=("batch_tile",))
def vae_forward(x, eps, packed, *, batch_tile=None):
    """x: (B, input_dim) f32; eps: (B, latent_dim) f32; packed: pack_params()."""
    B, input_dim = x.shape
    latent_dim = packed["b_mv"].shape[0] // 2
    output_dim = packed["w_out"].shape[0]

    tb = (batch_tile if batch_tile is not None
          else _choose_batch_tile(B, _num_parallel_cores()))
    assert B % tb == 0 and (tb % 128 == 0 or tb == B)
    grid = (B // tb,)

    # Transpose once in the wrapper so batch rides the 128-lane axis.
    x_t = x.T                # (input_dim, B)
    eps_t = eps.T            # (latent_dim, B)

    weight_args = [
        packed["w_in"], packed["b_in"],
        packed["w_in2"], packed["b_in2"],
        packed["w_mv"], packed["b_mv"],
        packed["w_h"], packed["b_h"],
        packed["w_h2"], packed["b_h2"],
        packed["w_out"], packed["b_out"],
    ]

    def col_spec(rows):
        return pl.BlockSpec((rows, tb), lambda i: (0, i))

    def full_spec(arr):
        # Constant block index: DMA'd once in the prologue, resident across steps.
        # TODO(synk): pipeline_mode=pl.Buffered(1) would drop the redundant second
        # buffer for these invariant inputs; omitted to keep lowering conservative.
        return pl.BlockSpec(arr.shape, lambda i: (0, 0))

    grid_spec = pltpu.PrefetchScalarGridSpec(
        num_scalar_prefetch=0,
        grid=grid,
        in_specs=[col_spec(input_dim), col_spec(latent_dim)]
        + [full_spec(w) for w in weight_args],
        out_specs=[
            col_spec(output_dim),          # x_hat, lane-dense
            col_spec(2 * latent_dim),      # mean || log_var, lane-dense
        ],
    )

    out_shapes = (
        jax.ShapeDtypeStruct((output_dim, B), jnp.float32),
        jax.ShapeDtypeStruct((2 * latent_dim, B), jnp.float32),
    )

    x_hat_t, stats_t = pl.pallas_call(
        functools.partial(vae_kernel, latent_dim=latent_dim),
        out_shape=out_shapes,
        grid_spec=grid_spec,
        compiler_params=pltpu.CompilerParams(
            dimension_semantics=("parallel",)
        ),
    )(x_t, eps_t, *weight_args)

    x_hat = x_hat_t.T
    stats = stats_t.T
    return x_hat, stats[:, :latent_dim], stats[:, latent_dim:]


def init_params(key, input_dim, hidden_dim, latent_dim, output_dim):
    """Deterministic PyTorch-Linear-style init (uniform +-1/sqrt(fan_in)).

    Weights are stored (in, out); biases as (1, out); packing for the kernel
    happens once in pack_params.
    """
    def linear(key, fan_in, fan_out):
        kw, kb = jax.random.split(key)
        bound = 1.0 / jnp.sqrt(fan_in)
        w = jax.random.uniform(kw, (fan_in, fan_out), jnp.float32, -bound, bound)
        b = jax.random.uniform(kb, (1, fan_out), jnp.float32, -bound, bound)
        return w, b

    keys = jax.random.split(key, 7)
    p = {}
    p["w_in"], p["b_in"] = linear(keys[0], input_dim, hidden_dim)
    p["w_in2"], p["b_in2"] = linear(keys[1], hidden_dim, hidden_dim)
    p["w_mean"], p["b_mean"] = linear(keys[2], hidden_dim, latent_dim)
    p["w_var"], p["b_var"] = linear(keys[3], hidden_dim, latent_dim)
    p["w_h"], p["b_h"] = linear(keys[4], latent_dim, hidden_dim)
    p["w_h2"], p["b_h2"] = linear(keys[5], hidden_dim, hidden_dim)
    p["w_out"], p["b_out"] = linear(keys[6], hidden_dim, output_dim)
    return p


def reference_forward(x, eps, params):
    """Pure-JAX f32 reference matching the PyTorch Model.forward semantics."""
    leaky = lambda v: jnp.where(v >= 0, v, 0.2 * v)
    h = leaky(x @ params["w_in"] + params["b_in"])
    h = leaky(h @ params["w_in2"] + params["b_in2"])
    mean = h @ params["w_mean"] + params["b_mean"]
    log_var = h @ params["w_var"] + params["b_var"]
    z = mean + jnp.exp(0.5 * log_var) * eps
    d = leaky(z @ params["w_h"] + params["b_h"])
    d = leaky(d @ params["w_h2"] + params["b_h2"])
    x_hat = jax.nn.sigmoid(d @ params["w_out"] + params["b_out"])
    return x_hat, mean, log_var


def reference_forward_bf16(x, eps, params):
    """Reference with the kernel's exact quantization: bf16 weights AND bf16
    matmul activations, f32 accumulation, f32 bias / elementwise math."""
    bf = lambda a: a.astype(jnp.bfloat16)
    leaky = lambda v: jnp.where(v >= 0, v, 0.2 * v)

    def lin(a, w, b):
        return jnp.dot(bf(a), bf(w), preferred_element_type=jnp.float32) + b

    h = leaky(lin(x, params["w_in"], params["b_in"]))
    h = leaky(lin(h, params["w_in2"], params["b_in2"]))
    mean = lin(h, params["w_mean"], params["b_mean"])
    log_var = lin(h, params["w_var"], params["b_var"])
    z = mean + jnp.exp(0.5 * log_var) * eps
    d = leaky(lin(z, params["w_h"], params["b_h"]))
    d = leaky(lin(d, params["w_h2"], params["b_h2"]))
    x_hat = jax.nn.sigmoid(lin(d, params["w_out"], params["b_out"]))
    return x_hat, mean, log_var


if __name__ == "__main__":
    batch = 256        # -> tb=256, grid=(1,) on v5e/v6e; tb=128 x 2 parallel on v7x
    input_dim = 32
    hidden_dim = 32
    latent_dim = 16
    output_dim = 32

    key = jax.random.PRNGKey(0)
    k_x, k_eps, k_p = jax.random.split(key, 3)

    x = jax.random.normal(k_x, (batch, input_dim), jnp.float32)
    # torch.randn_like equivalent: epsilon is drawn outside the kernel so the
    # kernel stays deterministic and directly testable.
    eps = jax.random.normal(k_eps, (batch, latent_dim), jnp.float32)

    params = init_params(k_p, input_dim, hidden_dim, latent_dim, output_dim)
    packed = pack_params(params)   # one-time: transpose + bf16 cast + mean/var fuse

    x_hat, mean, log_var = vae_forward(x, eps, packed)
    jax.block_until_ready((x_hat, mean, log_var))

    # Correctness: compare against a pure-JAX reference using the kernel's exact
    # quantization (bf16 weights + bf16 matmul activations, f32 accumulation),
    # so the check isolates kernel plumbing rather than deliberate quantization.
    ref_x_hat, ref_mean, ref_log_var = reference_forward_bf16(x, eps, params)
    assert jnp.allclose(x_hat, ref_x_hat, atol=2e-3, rtol=2e-3)
    assert jnp.allclose(mean, ref_mean, atol=2e-3, rtol=2e-3)
    assert jnp.allclose(log_var, ref_log_var, atol=2e-3, rtol=2e-3)

    print("KERNEL_OK")
</pallas_src>

<mosaic_0001>
module attributes {stable_mosaic.version = 11 : i64} {
  func.func @vae_kernel(%arg0: i32, %arg1: memref<32x256xf32, #tpu.memory_space<vmem>>, %arg2: memref<16x256xf32, #tpu.memory_space<vmem>>, %arg3: memref<32x32xbf16, #tpu.memory_space<vmem>>, %arg4: memref<32x1xf32, #tpu.memory_space<vmem>>, %arg5: memref<32x32xbf16, #tpu.memory_space<vmem>>, %arg6: memref<32x1xf32, #tpu.memory_space<vmem>>, %arg7: memref<32x32xbf16, #tpu.memory_space<vmem>>, %arg8: memref<32x1xf32, #tpu.memory_space<vmem>>, %arg9: memref<32x16xbf16, #tpu.memory_space<vmem>>, %arg10: memref<32x1xf32, #tpu.memory_space<vmem>>, %arg11: memref<32x32xbf16, #tpu.memory_space<vmem>>, %arg12: memref<32x1xf32, #tpu.memory_space<vmem>>, %arg13: memref<32x32xbf16, #tpu.memory_space<vmem>>, %arg14: memref<32x1xf32, #tpu.memory_space<vmem>>, %arg15: memref<32x256xf32, #tpu.memory_space<vmem>>, %arg16: memref<32x256xf32, #tpu.memory_space<vmem>>) attributes {dimension_semantics = [#tpu.dimension_semantics<parallel>], iteration_bounds = array<i64: 1>, scalar_prefetch = 0 : i64, scratch_operands = 0 : i64, tpu.core_type = #tpu.core_type<tc>, window_params = [{transform_indices = @transform_0, window_bounds = array<i64: 32, 256>}, {transform_indices = @transform_1, window_bounds = array<i64: 16, 256>}, {pipeline_mode = #tpu.pipeline_mode<synchronous>, transform_indices = @transform_2, window_bounds = array<i64: 32, 32>}, {pipeline_mode = #tpu.pipeline_mode<synchronous>, transform_indices = @transform_3, window_bounds = array<i64: 32, 1>}, {pipeline_mode = #tpu.pipeline_mode<synchronous>, transform_indices = @transform_4, window_bounds = array<i64: 32, 32>}, {pipeline_mode = #tpu.pipeline_mode<synchronous>, transform_indices = @transform_5, window_bounds = array<i64: 32, 1>}, {pipeline_mode = #tpu.pipeline_mode<synchronous>, transform_indices = @transform_6, window_bounds = array<i64: 32, 32>}, {pipeline_mode = #tpu.pipeline_mode<synchronous>, transform_indices = @transform_7, window_bounds = array<i64: 32, 1>}, {pipeline_mode = #tpu.pipeline_mode<synchronous>, transform_indices = @transform_8, window_bounds = array<i64: 32, 16>}, {pipeline_mode = #tpu.pipeline_mode<synchronous>, transform_indices = @transform_9, window_bounds = array<i64: 32, 1>}, {pipeline_mode = #tpu.pipeline_mode<synchronous>, transform_indices = @transform_10, window_bounds = array<i64: 32, 32>}, {pipeline_mode = #tpu.pipeline_mode<synchronous>, transform_indices = @transform_11, window_bounds = array<i64: 32, 1>}, {pipeline_mode = #tpu.pipeline_mode<synchronous>, transform_indices = @transform_12, window_bounds = array<i64: 32, 32>}, {pipeline_mode = #tpu.pipeline_mode<synchronous>, transform_indices = @transform_13, window_bounds = array<i64: 32, 1>}, {transform_indices = @transform_14, window_bounds = array<i64: 32, 256>}, {transform_indices = @transform_15, window_bounds = array<i64: 32, 256>}]} {
    %c0 = arith.constant 0 : index
    %c0_0 = arith.constant 0 : index
    %0 = vector.load %arg1[%c0, %c0_0] : memref<32x256xf32, #tpu.memory_space<vmem>>, vector<32x256xf32>
    %c0_1 = arith.constant 0 : index
    %c0_2 = arith.constant 0 : index
    %1 = vector.load %arg3[%c0_1, %c0_2] : memref<32x32xbf16, #tpu.memory_space<vmem>>, vector<32x32xbf16>
    %2 = arith.truncf %0 : vector<32x256xf32> to vector<32x256xbf16>
    %cst = arith.constant dense<0.000000e+00> : vector<32x256xf32>
    %3 = tpu.matmul %1, %2, %cst {dimension_numbers = #tpu.dot_dimension_numbers<[1], [0], [0], [1], [0, 0, 1, 1], [], []>} : vector<32x32xbf16>, vector<32x256xbf16>, vector<32x256xf32> -> vector<32x256xf32>
    %c0_3 = arith.constant 0 : index
    %c0_4 = arith.constant 0 : index
    %4 = vector.load %arg4[%c0_3, %c0_4] : memref<32x1xf32, #tpu.memory_space<vmem>>, vector<32x1xf32>
    %5 = vector.broadcast %4 : vector<32x1xf32> to vector<32x256xf32>
    %6 = arith.addf %3, %5 : vector<32x256xf32>
    %cst_5 = arith.constant 0.000000e+00 : f32
    %7 = vector.broadcast %cst_5 : f32 to vector<32x256xf32>
    %8 = arith.cmpf oge, %6, %7 : vector<32x256xf32>
    %cst_6 = arith.constant 2.000000e-01 : f32
    %9 = vector.broadcast %cst_6 : f32 to vector<32x256xf32>
    %10 = arith.mulf %9, %6 : vector<32x256xf32>
    %11 = arith.select %8, %6, %10 : vector<32x256xi1>, vector<32x256xf32>
    %c0_7 = arith.constant 0 : index
    %c0_8 = arith.constant 0 : index
    %12 = vector.load %arg5[%c0_7, %c0_8] : memref<32x32xbf16, #tpu.memory_space<vmem>>, vector<32x32xbf16>
    %13 = arith.truncf %11 : vector<32x256xf32> to vector<32x256xbf16>
    %cst_9 = arith.constant dense<0.000000e+00> : vector<32x256xf32>
    %14 = tpu.matmul %12, %13, %cst_9 {dimension_numbers = #tpu.dot_dimension_numbers<[1], [0], [0], [1], [0, 0, 1, 1], [], []>} : vector<32x32xbf16>, vector<32x256xbf16>, vector<32x256xf32> -> vector<32x256xf32>
    %c0_10 = arith.constant 0 : index
    %c0_11 = arith.constant 0 : index
    %15 = vector.load %arg6[%c0_10, %c0_11] : memref<32x1xf32, #tpu.memory_space<vmem>>, vector<32x1xf32>
    %16 = vector.broadcast %15 : vector<32x1xf32> to vector<32x256xf32>
    %17 = arith.addf %14, %16 : vector<32x256xf32>
    %cst_12 = arith.constant 0.000000e+00 : f32
    %18 = vector.broadcast %cst_12 : f32 to vector<32x256xf32>
    %19 = arith.cmpf oge, %17, %18 : vector<32x256xf32>
    %cst_13 = arith.constant 2.000000e-01 : f32
    %20 = vector.broadcast %cst_13 : f32 to vector<32x256xf32>
    %21 = arith.mulf %20, %17 : vector<32x256xf32>
    %22 = arith.select %19, %17, %21 : vector<32x256xi1>, vector<32x256xf32>
    %c0_14 = arith.constant 0 : index
    %c0_15 = arith.constant 0 : index
    %23 = vector.load %arg7[%c0_14, %c0_15] : memref<32x32xbf16, #tpu.memory_space<vmem>>, vector<32x32xbf16>
    %24 = arith.truncf %22 : vector<32x256xf32> to vector<32x256xbf16>
    %cst_16 = arith.constant dense<0.000000e+00> : vector<32x256xf32>
    %25 = tpu.matmul %23, %24, %cst_16 {dimension_numbers = #tpu.dot_dimension_numbers<[1], [0], [0], [1], [0, 0, 1, 1], [], []>} : vector<32x32xbf16>, vector<32x256xbf16>, vector<32x256xf32> -> vector<32x256xf32>
    %c0_17 = arith.constant 0 : index
    %c0_18 = arith.constant 0 : index
    %26 = vector.load %arg8[%c0_17, %c0_18] : memref<32x1xf32, #tpu.memory_space<vmem>>, vector<32x1xf32>
    %27 = vector.broadcast %26 : vector<32x1xf32> to vector<32x256xf32>
    %28 = arith.addf %25, %27 : vector<32x256xf32>
    %29 = vector.extract_strided_slice %28 {offsets = [0, 0], sizes = [16, 256], strides = [1, 1]} : vector<32x256xf32> to vector<16x256xf32>
    %30 = vector.extract_strided_slice %28 {offsets = [16, 0], sizes = [16, 256], strides = [1, 1]} : vector<32x256xf32> to vector<16x256xf32>
    %cst_19 = arith.constant 5.000000e-01 : f32
    %31 = vector.broadcast %cst_19 : f32 to vector<16x256xf32>
    %32 = arith.mulf %31, %30 : vector<16x256xf32>
    %33 = math.exp %32 : vector<16x256xf32>
    %c0_20 = arith.constant 0 : index
    %c0_21 = arith.constant 0 : index
    %34 = vector.load %arg2[%c0_20, %c0_21] : memref<16x256xf32, #tpu.memory_space<vmem>>, vector<16x256xf32>
    %35 = arith.mulf %33, %34 : vector<16x256xf32>
    %36 = arith.addf %29, %35 : vector<16x256xf32>
    %c0_22 = arith.constant 0 : index
    %c0_23 = arith.constant 0 : index
    %37 = vector.load %arg9[%c0_22, %c0_23] : memref<32x16xbf16, #tpu.memory_space<vmem>>, vector<32x16xbf16>
    %38 = arith.truncf %36 : vector<16x256xf32> to vector<16x256xbf16>
    %cst_24 = arith.constant dense<0.000000e+00> : vector<32x256xf32>
    %39 = tpu.matmul %37, %38, %cst_24 {dimension_numbers = #tpu.dot_dimension_numbers<[1], [0], [0], [1], [0, 0, 1, 1], [], []>} : vector<32x16xbf16>, vector<16x256xbf16>, vector<32x256xf32> -> vector<32x256xf32>
    %c0_25 = arith.constant 0 : index
    %c0_26 = arith.constant 0 : index
    %40 = vector.load %arg10[%c0_25, %c0_26] : memref<32x1xf32, #tpu.memory_space<vmem>>, vector<32x1xf32>
    %41 = vector.broadcast %40 : vector<32x1xf32> to vector<32x256xf32>
    %42 = arith.addf %39, %41 : vector<32x256xf32>
    %cst_27 = arith.constant 0.000000e+00 : f32
    %43 = vector.broadcast %cst_27 : f32 to vector<32x256xf32>
    %44 = arith.cmpf oge, %42, %43 : vector<32x256xf32>
    %cst_28 = arith.constant 2.000000e-01 : f32
    %45 = vector.broadcast %cst_28 : f32 to vector<32x256xf32>
    %46 = arith.mulf %45, %42 : vector<32x256xf32>
    %47 = arith.select %44, %42, %46 : vector<32x256xi1>, vector<32x256xf32>
    %c0_29 = arith.constant 0 : index
    %c0_30 = arith.constant 0 : index
    %48 = vector.load %arg11[%c0_29, %c0_30] : memref<32x32xbf16, #tpu.memory_space<vmem>>, vector<32x32xbf16>
    %49 = arith.truncf %47 : vector<32x256xf32> to vector<32x256xbf16>
    %cst_31 = arith.constant dense<0.000000e+00> : vector<32x256xf32>
    %50 = tpu.matmul %48, %49, %cst_31 {dimension_numbers = #tpu.dot_dimension_numbers<[1], [0], [0], [1], [0, 0, 1, 1], [], []>} : vector<32x32xbf16>, vector<32x256xbf16>, vector<32x256xf32> -> vector<32x256xf32>
    %c0_32 = arith.constant 0 : index
    %c0_33 = arith.constant 0 : index
    %51 = vector.load %arg12[%c0_32, %c0_33] : memref<32x1xf32, #tpu.memory_space<vmem>>, vector<32x1xf32>
    %52 = vector.broadcast %51 : vector<32x1xf32> to vector<32x256xf32>
    %53 = arith.addf %50, %52 : vector<32x256xf32>
    %cst_34 = arith.constant 0.000000e+00 : f32
    %54 = vector.broadcast %cst_34 : f32 to vector<32x256xf32>
    %55 = arith.cmpf oge, %53, %54 : vector<32x256xf32>
    %cst_35 = arith.constant 2.000000e-01 : f32
    %56 = vector.broadcast %cst_35 : f32 to vector<32x256xf32>
    %57 = arith.mulf %56, %53 : vector<32x256xf32>
    %58 = arith.select %55, %53, %57 : vector<32x256xi1>, vector<32x256xf32>
    %c0_36 = arith.constant 0 : index
    %c0_37 = arith.constant 0 : index
    %59 = vector.load %arg13[%c0_36, %c0_37] : memref<32x32xbf16, #tpu.memory_space<vmem>>, vector<32x32xbf16>
    %60 = arith.truncf %58 : vector<32x256xf32> to vector<32x256xbf16>
    %cst_38 = arith.constant dense<0.000000e+00> : vector<32x256xf32>
    %61 = tpu.matmul %59, %60, %cst_38 {dimension_numbers = #tpu.dot_dimension_numbers<[1], [0], [0], [1], [0, 0, 1, 1], [], []>} : vector<32x32xbf16>, vector<32x256xbf16>, vector<32x256xf32> -> vector<32x256xf32>
    %c0_39 = arith.constant 0 : index
    %c0_40 = arith.constant 0 : index
    %62 = vector.load %arg14[%c0_39, %c0_40] : memref<32x1xf32, #tpu.memory_space<vmem>>, vector<32x1xf32>
    %63 = vector.broadcast %62 : vector<32x1xf32> to vector<32x256xf32>
    %64 = arith.addf %61, %63 : vector<32x256xf32>
    %65 = arith.negf %64 : vector<32x256xf32>
    %66 = math.exp %65 : vector<32x256xf32>
    %cst_41 = arith.constant 1.000000e+00 : f32
    %67 = vector.broadcast %cst_41 : f32 to vector<32x256xf32>
    %68 = arith.addf %67, %66 : vector<32x256xf32>
    %69 = arith.divf %67, %68 : vector<32x256xf32>
    %c0_42 = arith.constant 0 : index
    %c0_43 = arith.constant 0 : index
    %70 = vector.load %arg15[%c0_42, %c0_43] : memref<32x256xf32, #tpu.memory_space<vmem>>, vector<32x256xf32>
    tpu.vector_store %arg15[%c0_42, %c0_43], %69 {strides = array<i32>} : memref<32x256xf32, #tpu.memory_space<vmem>>, vector<32x256xf32>,
    %c0_44 = arith.constant 0 : index
    %c0_45 = arith.constant 0 : index
    %71 = vector.load %arg16[%c0_44, %c0_45] : memref<32x256xf32, #tpu.memory_space<vmem>>, vector<32x256xf32>
    tpu.vector_store %arg16[%c0_44, %c0_45], %28 {strides = array<i32>} : memref<32x256xf32, #tpu.memory_space<vmem>>, vector<32x256xf32>,
    return
  }
  func.func @transform_0(%arg0: i32) -> (i32, i32) {
    %c0_i32 = arith.constant 0 : i32
    %c0_i32_0 = arith.constant 0 : i32
    return %c0_i32, %arg0 : i32, i32
  }
  func.func @transform_1(%arg0: i32) -> (i32, i32) {
    %c0_i32 = arith.constant 0 : i32
    %c0_i32_0 = arith.constant 0 : i32
    return %c0_i32, %arg0 : i32, i32
  }
  func.func @transform_2(%arg0: i32) -> (i32, i32) {
    %c0_i32 = arith.constant 0 : i32
    %c0_i32_0 = arith.constant 0 : i32
    %c0_i32_1 = arith.constant 0 : i32
    return %c0_i32, %c0_i32_0 : i32, i32
  }
  func.func @transform_3(%arg0: i32) -> (i32, i32) {
    %c0_i32 = arith.constant 0 : i32
    %c0_i32_0 = arith.constant 0 : i32
    %c0_i32_1 = arith.constant 0 : i32
    return %c0_i32, %c0_i32_0 : i32, i32
  }
  func.func @transform_4(%arg0: i32) -> (i32, i32) {
    %c0_i32 = arith.constant 0 : i32
    %c0_i32_0 = arith.constant 0 : i32
    %c0_i32_1 = arith.constant 0 : i32
    return %c0_i32, %c0_i32_0 : i32, i32
  }
  func.func @transform_5(%arg0: i32) -> (i32, i32) {
    %c0_i32 = arith.constant 0 : i32
    %c0_i32_0 = arith.constant 0 : i32
    %c0_i32_1 = arith.constant 0 : i32
    return %c0_i32, %c0_i32_0 : i32, i32
  }
  func.func @transform_6(%arg0: i32) -> (i32, i32) {
    %c0_i32 = arith.constant 0 : i32
    %c0_i32_0 = arith.constant 0 : i32
    %c0_i32_1 = arith.constant 0 : i32
    return %c0_i32, %c0_i32_0 : i32, i32
  }
  func.func @transform_7(%arg0: i32) -> (i32, i32) {
    %c0_i32 = arith.constant 0 : i32
    %c0_i32_0 = arith.constant 0 : i32
    %c0_i32_1 = arith.constant 0 : i32
    return %c0_i32, %c0_i32_0 : i32, i32
  }
  func.func @transform_8(%arg0: i32) -> (i32, i32) {
    %c0_i32 = arith.constant 0 : i32
    %c0_i32_0 = arith.constant 0 : i32
    %c0_i32_1 = arith.constant 0 : i32
    return %c0_i32, %c0_i32_0 : i32, i32
  }
  func.func @transform_9(%arg0: i32) -> (i32, i32) {
    %c0_i32 = arith.constant 0 : i32
    %c0_i32_0 = arith.constant 0 : i32
    %c0_i32_1 = arith.constant 0 : i32
    return %c0_i32, %c0_i32_0 : i32, i32
  }
  func.func @transform_10(%arg0: i32) -> (i32, i32) {
    %c0_i32 = arith.constant 0 : i32
    %c0_i32_0 = arith.constant 0 : i32
    %c0_i32_1 = arith.constant 0 : i32
    return %c0_i32, %c0_i32_0 : i32, i32
  }
  func.func @transform_11(%arg0: i32) -> (i32, i32) {
    %c0_i32 = arith.constant 0 : i32
    %c0_i32_0 = arith.constant 0 : i32
    %c0_i32_1 = arith.constant 0 : i32
    return %c0_i32, %c0_i32_0 : i32, i32
  }
  func.func @transform_12(%arg0: i32) -> (i32, i32) {
    %c0_i32 = arith.constant 0 : i32
    %c0_i32_0 = arith.constant 0 : i32
    %c0_i32_1 = arith.constant 0 : i32
    return %c0_i32, %c0_i32_0 : i32, i32
  }
  func.func @transform_13(%arg0: i32) -> (i32, i32) {
    %c0_i32 = arith.constant 0 : i32
    %c0_i32_0 = arith.constant 0 : i32
    %c0_i32_1 = arith.constant 0 : i32
    return %c0_i32, %c0_i32_0 : i32, i32
  }
  func.func @transform_14(%arg0: i32) -> (i32, i32) {
    %c0_i32 = arith.constant 0 : i32
    %c0_i32_0 = arith.constant 0 : i32
    return %c0_i32, %arg0 : i32, i32
  }
  func.func @transform_15(%arg0: i32) -> (i32, i32) {
    %c0_i32 = arith.constant 0 : i32
    %c0_i32_0 = arith.constant 0 : i32
    return %c0_i32, %arg0 : i32, i32
  }
}

</mosaic_0001>

<bundles_post_ra>
// kernel: vae_forward.1
= control target key start
LH: loop header
LB: loop body
LE: loop exit
PB: predicated region body
PF: predicated region fallthrough
CT: control target
= control target key end

     0   :  { %v983_v7 = vmov 0   ;;  %vm101_vm0 = vcmask 261120   ;;  %s1271_s0 = inlined_call_operand.vmem [shape: f32[32,256], index: 0, kind: input, shape index: {}]   ;;  %s1272_s1 = inlined_call_operand.vmem [shape: f32[16,256], index: 1, kind: input, shape index: {}]   ;;  %s1273_s2 = inlined_call_operand.vmem [shape: bf16[32,32], index: 2, kind: input, shape index: {}]   ;;  %s1274_s3 = inlined_call_operand.vmem [shape: f32[32,1], index: 3, kind: input, shape index: {}]   ;;  %s1275_s4 = inlined_call_operand.vmem [shape: bf16[32,32], index: 4, kind: input, shape index: {}]   ;;  %s1276_s5 = inlined_call_operand.vmem [shape: f32[32,1], index: 5, kind: input, shape index: {}]   ;;  %s1277_s6 = inlined_call_operand.vmem [shape: bf16[32,32], index: 6, kind: input, shape index: {}]   ;;  %s1278_s7 = inlined_call_operand.vmem [shape: f32[32,1], index: 7, kind: input, shape index: {}]   ;;  %s1279_s8 = inlined_call_operand.vmem [shape: bf16[32,16], index: 8, kind: input, shape index: {}]   ;;  %s1280_s9 = inlined_call_operand.vmem [shape: f32[32,1], index: 9, kind: input, shape index: {}]   ;;  %s1281_s10 = inlined_call_operand.vmem [shape: bf16[32,32], index: 10, kind: input, shape index: {}]   ;;  %s1282_s11 = inlined_call_operand.vmem [shape: f32[32,1], index: 11, kind: input, shape index: {}]   ;;  %s1283_s12 = inlined_call_operand.vmem [shape: bf16[32,32], index: 12, kind: input, shape index: {}]   ;;  %s1284_s13 = inlined_call_operand.vmem [shape: f32[32,1], index: 13, kind: input, shape index: {}]   ;;  %s1285_s14 = inlined_call_operand.hbm [shape: f32[32,256], index: 14, kind: output, shape index: {0}]   ;;  %s1286_s15 = inlined_call_operand.vmem [shape: f32[32,256], index: 15, kind: output, shape index: {1}]  }
   0x1   :  { %v52_v0 = vld [vmem:[%s1271_s0 + $0x8] sm:$0xff]  ;;  %v54_v1 = vld [vmem:[%s1271_s0 + $0x18] sm:$0xff]  ;;  %v51_v2 = vld [vmem:[%s1271_s0] sm:$0xff]  ;;  %140 = vmatprep.mubr.bf16.mxu0 %v983_v7  ;;  %905 = vset.pattern.permute.xlu0 %v983_v7 }
   0x2   :  { %v64_v3 = vpack.c.bf16 %v54_v1, %v52_v0  ;;  %v53_v4 = vld [vmem:[%s1271_s0 + $0x10] sm:$0xff]  ;;  %v56_v5 = vld [vmem:[%s1271_s0 + $0x28] sm:$0xff]  ;;  %v58_v6 = vld [vmem:[%s1271_s0 + $0x38] sm:$0xff]  ;;  %906 = vset.pattern.permute.xlu1 %v983_v7  ;;  %265 = vmatprep.mubr.bf16.mxu1 %v983_v7 }
   0x3   :  { %v63_v8 = vpack.c.bf16 %v53_v4, %v51_v2  ;;  %v66_v9 = vpack.c.bf16 %v58_v6, %v56_v5  ;;  %v55_v10 = vld [vmem:[%s1271_s0 + $0x20] sm:$0xff]  ;;  %v57_v11 = vld [vmem:[%s1271_s0 + $0x30] sm:$0xff]  ;;  %v68_v15 = vld [vmem:[%s1274_s3 + $0x8] sm:$0xff] }
   0x4   :  { %108 = vmatprep.subr.bf16.mxu0 %v64_v3  ;;  %v65_v12 = vpack.c.bf16 %v57_v11, %v55_v10  ;;  %v67_v13 = vld [vmem:[%s1274_s3] sm:$0xff]  ;;  %v69_v14 = vld [vmem:[%s1274_s3 + $0x10] sm:$0xff]  ;;  %v70_v17 = vld [vmem:[%s1274_s3 + $0x18] sm:$0xff] }
   0x5   :  { %109 = vmatpush1.bf16.msra.mxu0 %v63_v8  ;;  %73 = vperm.xlu0 %905, %v67_v13   ;;  %v907_v16 = vld [vmem:[%s1273_s2] sm:$0xff]   ;;  %v194_v19 = vld [vmem:[%s1276_s5 + $0x8] sm:$0xff]  ;;  %v195_v20 = vld [vmem:[%s1276_s5 + $0x10] sm:$0xff] }
   0x6   :  { %110 = vmatprep.subr.bf16.mxu0 %v66_v9  ;;  %83 = vperm.xlu1 %906, %v69_v14   ;;  %v193_v18 = vld [vmem:[%s1276_s5] sm:$0xff]  ;;  %v908_v21 = vld [vmem:[%s1273_s2 + $0x8] sm:$0xff]   ;;  %v196_v22 = vld [vmem:[%s1276_s5 + $0x18] sm:$0xff] }
   0x7   :  { %v320_v23 = vld [vmem:[%s1278_s7 + $0x10] sm:$0xff]  ;;  %v321_v24 = vld [vmem:[%s1278_s7 + $0x18] sm:$0xff] }
   0x9   :  { %111 = vmatpush1.bf16.msra.mxu0 %v65_v12  ;;  %78 = vperm.xlu0 %905, %v68_v15  }
   0xa   :  { %88 = vperm.xlu1 %906, %v70_v17  }
   0xc   :  { %871 = vmatmul.mubr.msk.bf16.vlgmr.msra.gmra.mrb[0].mxu0 %vm101_vm0, %v907_v16 }
   0xd   :  { %150 = vmatprep.mubr.bf16.mxu0 %v983_v7  ;;  %199 = vperm.xlu0 %905, %v193_v18  }
   0xe   :  { %204 = vperm.xlu1 %906, %v194_v19  }
  0x11   :  { %209 = vperm.xlu0 %905, %v195_v20  }
  0x12   :  { %214 = vperm.xlu1 %906, %v196_v22  }
  0x14   :  { %872 = vmatmul.mubr.msk.bf16.gmra.mrb[4].mxu0 %vm101_vm0, %v908_v21 }
  0x15   :  { %21 = vsyncpa [#allocation3], 0  ;;  %390 = vmatprep.mubr.bf16.mxu0 %v983_v7  ;;  %334 = vperm.xlu0 %905, %v320_v23   ;;  %v318_v25 = vld [vmem:[%s1278_s7] sm:$0xff]  ;;  %v319_v26 = vld [vmem:[%s1278_s7 + $0x8] sm:$0xff] }
  0x16   :  { %339 = vperm.xlu1 %906, %v321_v24   ;;  %v441_v27 = vld [vmem:[%s1280_s9] sm:$0xff]  ;;  %v442_v28 = vld [vmem:[%s1280_s9 + $0x8] sm:$0xff]  ;;  %v443_v29 = vld [vmem:[%s1280_s9 + $0x10] sm:$0xff] }
  0x17   :  { %v444_v30 = vld [vmem:[%s1280_s9 + $0x18] sm:$0xff]  ;;  %v567_v31 = vld [vmem:[%s1282_s11] sm:$0xff]  ;;  %v568_v32 = vld [vmem:[%s1282_s11 + $0x8] sm:$0xff] }
  0x18   :  { %v569_v33 = vld [vmem:[%s1282_s11 + $0x10] sm:$0xff]  ;;  %v570_v34 = vld [vmem:[%s1282_s11 + $0x18] sm:$0xff]  ;;  %v692_v35 = vld [vmem:[%s1284_s13] sm:$0xff] }
  0x19   :  { %324 = vperm.xlu0 %905, %v318_v25   ;;  %v693_v36 = vld [vmem:[%s1284_s13 + $0x8] sm:$0xff]  ;;  %v694_v37 = vld [vmem:[%s1284_s13 + $0x10] sm:$0xff]  ;;  %v695_v38 = vld [vmem:[%s1284_s13 + $0x18] sm:$0xff] }
  0x1a   :  { %329 = vperm.xlu1 %906, %v319_v26   ;;  %v909_v16 = vld [vmem:[%s1275_s4] sm:$0xff]   ;;  %v910_v17 = vld [vmem:[%s1275_s4 + $0x8] sm:$0xff]  }
  0x1d   :  { %447 = vperm.xlu0 %905, %v441_v27  }
  0x1e   :  { %452 = vperm.xlu1 %906, %v442_v28  }
  0x21   :  { %457 = vperm.xlu0 %905, %v443_v29  }
  0x22   :  { %462 = vperm.xlu1 %906, %v444_v30  }
  0x25   :  { %573 = vperm.xlu0 %905, %v567_v31  }
  0x26   :  { %578 = vperm.xlu1 %906, %v568_v32  }
  0x29   :  { %583 = vperm.xlu0 %905, %v569_v33  }
  0x2a   :  { %588 = vperm.xlu1 %906, %v570_v34  }
  0x2d   :  { %698 = vperm.xlu0 %905, %v692_v35  }
  0x2e   :  { %703 = vperm.xlu1 %906, %v693_v36  }
  0x31   :  { %708 = vperm.xlu0 %905, %v694_v37  }
  0x32   :  { %713 = vperm.xlu1 %906, %v695_v38  }
  0x84   :  { %v74_v39 = vpop.permute.xlu0 %73 }
  0x85   :  { %v84_v49 = vpop.permute.xlu1 %83 }
  0x88   :  { %v79_v43 = vpop.permute.xlu0 %78 }
  0x89   :  { %v89_v63 = vpop.permute.xlu1 %88 }
  0x8c   :  { %v200_v18 = vpop.permute.xlu0 %199 }
  0x8d   :  { %v205_v22 = vpop.permute.xlu1 %204 }
  0x90   :  { %v210_v34 = vpop.permute.xlu0 %209 }
  0xdf   :  { %v142_v40 = vpop.f32.mrb[0].mxu0 }
  0xe0   :  { %v143_v41 = vadd.f32 %v142_v40, %v74_v39  ;;  %v144_v42 = vpop.f32.mrb[1].mxu0 }
  0xe1   :  { %v145_v44 = vadd.f32 %v144_v42, %v74_v39  ;;  %v146_v45 = vpop.f32.mrb[2].mxu0  ;;  %v215_v42 = vpop.permute.xlu1 %214 }
  0xe2   :  { %v169_v46 = vmul.f32 0.2, %v143_v41  ;;  %v147_v47 = vadd.f32 %v146_v45, %v79_v43  ;;  %v148_v48 = vpop.f32.mrb[3].mxu0  ;;  %vm161_vm1 = vcmp.ge.f32.partialorder %v143_v41, 0.0 }
  0xe3   :  { %v170_v50 = vmul.f32 0.2, %v145_v44  ;;  %v149_v51 = vadd.f32 %v148_v48, %v79_v43  ;;  %vm162_vm2 = vcmp.ge.f32.partialorder %v145_v44, 0.0 }
  0xe4   :  { %v171_v52 = vmul.f32 0.2, %v147_v47  ;;  %vm163_vm3 = vcmp.ge.f32.partialorder %v147_v47, 0.0  ;;  %v177_v54 = vsel %vm161_vm1, %v143_v41, %v169_v46 }
  0xe5   :  { %v172_v53 = vmul.f32 0.2, %v149_v51  ;;  %vm164_vm4 = vcmp.ge.f32.partialorder %v149_v51, 0.0  ;;  %v178_v57 = vsel %vm162_vm2, %v145_v44, %v170_v50  ;;  %vm475_vm2 = vcmask 130048  }
  0xe6   :  { %v179_v55 = vsel %vm163_vm3, %v147_v47, %v171_v52 }
  0xe7   :  { %v152_v56 = vpop.f32.mrb[4].mxu0  ;;  %v180_v58 = vsel %vm164_vm4, %v149_v51, %v172_v53  ;;  %v189_v59 = vpack.c.bf16 %v179_v55, %v177_v54 }
  0xe8   :  { %v153_v60 = vadd.f32 %v152_v56, %v84_v49  ;;  %v154_v61 = vpop.f32.mrb[5].mxu0  ;;  %v190_v62 = vpack.c.bf16 %v180_v58, %v178_v57  ;;  %v911_v58 = vld [vmem:[%s1277_s6] sm:$0xff]  }
  0xe9   :  { %v155_v0 = vadd.f32 %v154_v61, %v84_v49  ;;  %v156_v1 = vpop.f32.mrb[6].mxu0  ;;  %v340_v61 = vpop.permute.xlu1 %339 }
  0xea   :  { %v173_v2 = vmul.f32 0.2, %v153_v60  ;;  %v157_v3 = vadd.f32 %v156_v1, %v89_v63  ;;  %v158_v4 = vpop.f32.mrb[7].mxu0  ;;  %233 = vmatprep.subr.bf16.mxu1 %v190_v62  ;;  %vm165_vm5 = vcmp.ge.f32.partialorder %v153_v60, 0.0 }
  0xeb   :  { %v174_v5 = vmul.f32 0.2, %v155_v0  ;;  %v159_v6 = vadd.f32 %v158_v4, %v89_v63  ;;  %234 = vmatpush1.bf16.msra.mxu1 %v189_v59  ;;  %vm166_vm6 = vcmp.ge.f32.partialorder %v155_v0, 0.0  ;;  %v912_v59 = vld [vmem:[%s1277_s6 + $0x8] sm:$0xff]  }
  0xec   :  { %vm167_vm7 = vcmp.ge.f32.partialorder %v157_v3, 0.0  ;;  %v175_v8 = vmul.f32 0.2, %v157_v3  ;;  %v181_v10 = vsel %vm165_vm5, %v153_v60, %v173_v2  ;;  %v335_v60 = vpop.permute.xlu0 %334 }
  0xed   :  { %vm168_vm8 = vcmp.ge.f32.partialorder %v159_v6, 0.0  ;;  %v176_v9 = vmul.f32 0.2, %v159_v6  ;;  %v182_v12 = vsel %vm166_vm6, %v155_v0, %v174_v5  ;;  %v330_v2 = vpop.permute.xlu1 %329 }
  0xee   :  { %v183_v11 = vsel %vm167_vm7, %v157_v3, %v175_v8 }
  0xef   :  { %v184_v13 = vsel %vm168_vm8, %v159_v6, %v176_v9  ;;  %v191_v14 = vpack.c.bf16 %v183_v11, %v181_v10 }
  0xf0   :  { %v192_v15 = vpack.c.bf16 %v184_v13, %v182_v12  ;;  %v325_v62 = vpop.permute.xlu0 %324 }
  0xf2   :  { %235 = vmatprep.subr.bf16.mxu1 %v192_v15 }
  0xf3   :  { %236 = vmatpush1.bf16.msra.mxu1 %v191_v14 }
  0xf6   :  { %875 = vmatmul.mubr.msk.bf16.vlgmr.msra.gmra.mrb[0].mxu1 %vm101_vm0, %v909_v16 }
  0xf7   :  { %275 = vmatprep.mubr.bf16.mxu1 %v983_v7 }
  0xfe   :  { %876 = vmatmul.mubr.msk.bf16.gmra.mrb[4].mxu1 %vm101_vm0, %v910_v17 }
  0xff   :  { %514 = vmatprep.mubr.bf16.mxu1 %v983_v7 }
 0x1c9   :  { %v267_v19 = vpop.f32.mrb[0].mxu1 }
 0x1ca   :  { %v268_v20 = vadd.f32 %v267_v19, %v200_v18  ;;  %v269_v21 = vpop.f32.mrb[1].mxu1 }
 0x1cb   :  { %v270_v23 = vadd.f32 %v269_v21, %v200_v18  ;;  %v271_v24 = vpop.f32.mrb[2].mxu1 }
 0x1cc   :  { %v294_v25 = vmul.f32 0.2, %v268_v20  ;;  %v272_v26 = vadd.f32 %v271_v24, %v205_v22  ;;  %v273_v27 = vpop.f32.mrb[3].mxu1  ;;  %vm286_vm9 = vcmp.ge.f32.partialorder %v268_v20, 0.0 }
 0x1cd   :  { %v295_v28 = vmul.f32 0.2, %v270_v23  ;;  %v274_v29 = vadd.f32 %v273_v27, %v205_v22  ;;  %vm287_vm10 = vcmp.ge.f32.partialorder %v270_v23, 0.0 }
 0x1ce   :  { %vm288_vm11 = vcmp.ge.f32.partialorder %v272_v26, 0.0  ;;  %v296_v30 = vmul.f32 0.2, %v272_v26  ;;  %v302_v32 = vsel %vm286_vm9, %v268_v20, %v294_v25  ;;  %v423_v25 = vld [vmem:[%s1272_s1] sm:$0xff] }
 0x1cf   :  { %vm289_vm12 = vcmp.ge.f32.partialorder %v274_v29, 0.0  ;;  %v297_v31 = vmul.f32 0.2, %v274_v29  ;;  %v303_v37 = vsel %vm287_vm10, %v270_v23, %v295_v28  ;;  %v425_v28 = vld [vmem:[%s1272_s1 + $0x10] sm:$0xff] }
 0x1d0   :  { %v304_v33 = vsel %vm288_vm11, %v272_v26, %v296_v30  ;;  %v424_v26 = vld [vmem:[%s1272_s1 + $0x8] sm:$0xff]  ;;  %v426_v30 = vld [vmem:[%s1272_s1 + $0x18] sm:$0xff] }
 0x1d1   :  { %v314_v35 = vpack.c.bf16 %v304_v33, %v302_v32  ;;  %v277_v36 = vpop.f32.mrb[4].mxu1  ;;  %v305_v38 = vsel %vm289_vm12, %v274_v29, %v297_v31 }
 0x1d2   :  { %v278_v39 = vadd.f32 %v277_v36, %v210_v34  ;;  %v279_v40 = vpop.f32.mrb[5].mxu1  ;;  %v315_v41 = vpack.c.bf16 %v305_v38, %v303_v37 }
 0x1d3   :  { %v280_v43 = vadd.f32 %v279_v40, %v210_v34  ;;  %v281_v44 = vpop.f32.mrb[6].mxu1 }
 0x1d4   :  { %v298_v45 = vmul.f32 0.2, %v278_v39  ;;  %v282_v46 = vadd.f32 %v281_v44, %v215_v42  ;;  %v283_v47 = vpop.f32.mrb[7].mxu1  ;;  %358 = vmatprep.subr.bf16.mxu0 %v315_v41  ;;  %vm290_vm13 = vcmp.ge.f32.partialorder %v278_v39, 0.0  ;;  %v914_v44 = vld [vmem:[%s1279_s8 + $0x8] sm:$0xff]  }
 0x1d5   :  { %v299_v48 = vmul.f32 0.2, %v280_v43  ;;  %v284_v49 = vadd.f32 %v283_v47, %v215_v42  ;;  %359 = vmatpush1.bf16.msra.mxu0 %v314_v35  ;;  %vm291_vm14 = vcmp.ge.f32.partialorder %v280_v43, 0.0 }
 0x1d6   :  { %vm292_vm15 = vcmp.ge.f32.partialorder %v282_v46, 0.0  ;;  %v300_v50 = vmul.f32 0.2, %v282_v46  ;;  %v306_v52 = vsel %vm290_vm13, %v278_v39, %v298_v45  ;;  %v448_v45 = vpop.permute.xlu0 %447 }
 0x1d7   :  { %vm293_vm1 = vcmp.ge.f32.partialorder %v284_v49, 0.0  ;;  %v301_v51 = vmul.f32 0.2, %v284_v49  ;;  %v307_v55 = vsel %vm291_vm14, %v280_v43, %v299_v48  ;;  %v913_v43 = vld [vmem:[%s1279_s8] sm:$0xff]  }
 0x1d8   :  { %v308_v53 = vsel %vm292_vm15, %v282_v46, %v300_v50 }
 0x1d9   :  { %v316_v54 = vpack.c.bf16 %v308_v53, %v306_v52  ;;  %v309_v56 = vsel %vm293_vm1, %v284_v49, %v301_v51  ;;  %v453_v49 = vpop.permute.xlu1 %452 }
 0x1da   :  { %v317_v57 = vpack.c.bf16 %v309_v56, %v307_v55 }
 0x1dc   :  { %360 = vmatprep.subr.bf16.mxu0 %v317_v57 }
 0x1dd   :  { %361 = vmatpush1.bf16.msra.mxu0 %v316_v54 }
 0x1e0   :  { %879 = vmatmul.mubr.msk.bf16.vlgmr.msra.gmra.mrb[8].mxu0 %vm101_vm0, %v911_v58 }
 0x1e1   :  { %400 = vmatprep.mubr.bf16.mxu0 %v983_v7 }
 0x1e8   :  { %880 = vmatmul.mubr.msk.bf16.gmra.mrb[12].mxu0 %vm101_vm0, %v912_v59 }
 0x1e9   :  { %639 = vmatprep.mubr.bf16.mxu0 %v983_v7 }
 0x2b3   :  { %v392_v63 = vpop.f32.mrb[8].mxu0 }
 0x2b4   :  { %v393_v0 = vadd.f32 %v392_v63, %v325_v62  ;;  %v394_v1 = vpop.f32.mrb[9].mxu0 }
 0x2b5   :  { %v395_v3 = vadd.f32 %v394_v1, %v325_v62  ;;  %v396_v4 = vpop.f32.mrb[10].mxu0 }
 0x2b6   :  { %841 = vst [vmem:[%s1286_s15] sm:$0xff] %v393_v0  ;;  %v397_v5 = vadd.f32 %v396_v4, %v330_v2  ;;  %v398_v6 = vpop.f32.mrb[11].mxu0 }
 0x2b7   :  { %842 = vst [vmem:[%s1286_s15 + $0x8] sm:$0xff] %v395_v3  ;;  %v399_v8 = vadd.f32 %v398_v6, %v330_v2 }
 0x2b8   :  { %843 = vst [vmem:[%s1286_s15 + $0x10] sm:$0xff] %v397_v5 }
 0x2b9   :  { %844 = vst [vmem:[%s1286_s15 + $0x18] sm:$0xff] %v399_v8 }
 0x2bb   :  { %v402_v9 = vpop.f32.mrb[12].mxu0 }
 0x2bc   :  { %v403_v10 = vadd.f32 %v402_v9, %v335_v60  ;;  %v404_v11 = vpop.f32.mrb[13].mxu0 }
 0x2bd   :  { %v405_v12 = vadd.f32 %v404_v11, %v335_v60  ;;  %v406_v13 = vpop.f32.mrb[14].mxu0 }
 0x2be   :  { %v411_v14 = vmul.f32 0.5, %v403_v10  ;;  %845 = vst [vmem:[%s1286_s15 + $0x20] sm:$0xff] %v403_v10  ;;  %v407_v15 = vadd.f32 %v406_v13, %v340_v61  ;;  %v408_v16 = vpop.f32.mrb[15].mxu0 }
 0x2bf   :  { %v412_v17 = vmul.f32 0.5, %v405_v12  ;;  %846 = vst [vmem:[%s1286_s15 + $0x28] sm:$0xff] %v405_v12  ;;  %v409_v18 = vadd.f32 %v408_v16, %v340_v61  ;;  %v458_v61 = vpop.permute.xlu0 %457 }
 0x2c0   :  { %v415_v19 = vmul.f32 1.442695, %v411_v14  ;;  %v413_v20 = vmul.f32 0.5, %v407_v15  ;;  %847 = vst [vmem:[%s1286_s15 + $0x30] sm:$0xff] %v407_v15 }
 0x2c1   :  { %v417_v21 = vmul.f32 1.442695, %v412_v17  ;;  %v414_v22 = vmul.f32 0.5, %v409_v18  ;;  %848 = vst [vmem:[%s1286_s15 + $0x38] sm:$0xff] %v409_v18 }
 0x2c2   :  { %919 = vpow2.f32 %v415_v19  ;;  %v419_v23 = vmul.f32 1.442695, %v413_v20 }
 0x2c3   :  { %921 = vpow2.f32 %v417_v21  ;;  %v421_v24 = vmul.f32 1.442695, %v414_v22  ;;  %v915_v22 = vld [vmem:[%s1281_s10] sm:$0xff]  }
 0x2c4   :  { %923 = vpow2.f32 %v419_v23  ;;  %v916_v23 = vld [vmem:[%s1281_s10 + $0x8] sm:$0xff]  }
 0x2c5   :  { %925 = vpow2.f32 %v421_v24  ;;  %v574_v24 = vpop.permute.xlu0 %573 }
 0x2cc   :  { %v920_v27 = vpop.eup %919 }
 0x2cd   :  { %v922_v29 = vpop.eup %921  ;;  %v427_v31 = vmul.f32 %v920_v27, %v423_v25 }
 0x2ce   :  { %v924_v32 = vpop.eup %923  ;;  %v428_v33 = vmul.f32 %v922_v29, %v424_v26 }
 0x2cf   :  { %v926_v34 = vpop.eup %925  ;;  %v429_v35 = vmul.f32 %v924_v32, %v425_v28  ;;  %v431_v36 = vadd.f32 %v427_v31, %v393_v0 }
 0x2d0   :  { %v430_v37 = vmul.f32 %v926_v34, %v426_v30  ;;  %v432_v38 = vadd.f32 %v428_v33, %v395_v3 }
 0x2d1   :  { %v433_v39 = vadd.f32 %v429_v35, %v397_v5  ;;  %v463_v5 = vpop.permute.xlu1 %462 }
 0x2d2   :  { %v434_v40 = vadd.f32 %v430_v37, %v399_v8 }
 0x2d3   :  { %v439_v41 = vpack.c.bf16 %v433_v39, %v431_v36 }
 0x2d4   :  { %v440_v42 = vpack.c.bf16 %v434_v40, %v432_v38  ;;  %v584_v40 = vpop.permute.xlu0 %583 }
 0x2d5   :  { %v579_v28 = vpop.permute.xlu1 %578 }
 0x2d6   :  { %482 = vmatprep.subr.bf16.mxu1 %v440_v42 }
 0x2d7   :  { %483 = vmatpush1.bf16.msra.mxu1 %v439_v41 }
 0x2da   :  { %883 = vmatmul.mubr.msk.bf16.vlgmr.msra.gmra.mrb[8].mxu1 %vm475_vm2, %v913_v43 }
 0x2db   :  { %524 = vmatprep.mubr.bf16.mxu1 %v983_v7 }
 0x2e2   :  { %884 = vmatmul.mubr.msk.bf16.gmra.mrb[12].mxu1 %vm475_vm2, %v914_v44 }
 0x2e3   :  { %764 = vmatprep.mubr.bf16.mxu1 %v983_v7 }
 0x3ad   :  { %v516_v46 = vpop.f32.mrb[8].mxu1 }
 0x3ae   :  { %v517_v47 = vadd.f32 %v516_v46, %v448_v45  ;;  %v518_v48 = vpop.f32.mrb[9].mxu1 }
 0x3af   :  { %v519_v50 = vadd.f32 %v518_v48, %v448_v45  ;;  %v520_v51 = vpop.f32.mrb[10].mxu1  ;;  %v589_v48 = vpop.permute.xlu1 %588 }
 0x3b0   :  { %v543_v52 = vmul.f32 0.2, %v517_v47  ;;  %v521_v53 = vadd.f32 %v520_v51, %v453_v49  ;;  %v522_v54 = vpop.f32.mrb[11].mxu1  ;;  %vm535_vm3 = vcmp.ge.f32.partialorder %v517_v47, 0.0 }
 0x3b1   :  { %v544_v55 = vmul.f32 0.2, %v519_v50  ;;  %v523_v56 = vadd.f32 %v522_v54, %v453_v49  ;;  %vm536_vm4 = vcmp.ge.f32.partialorder %v519_v50, 0.0 }
 0x3b2   :  { %vm537_vm5 = vcmp.ge.f32.partialorder %v521_v53, 0.0  ;;  %v545_v57 = vmul.f32 0.2, %v521_v53  ;;  %v551_v59 = vsel %vm535_vm3, %v517_v47, %v543_v52 }
 0x3b3   :  { %vm538_vm6 = vcmp.ge.f32.partialorder %v523_v56, 0.0  ;;  %v546_v58 = vmul.f32 0.2, %v523_v56  ;;  %v552_v0 = vsel %vm536_vm4, %v519_v50, %v544_v55 }
 0x3b4   :  { %v553_v60 = vsel %vm537_vm5, %v521_v53, %v545_v57 }
 0x3b5   :  { %v563_v62 = vpack.c.bf16 %v553_v60, %v551_v59  ;;  %v526_v63 = vpop.f32.mrb[12].mxu1  ;;  %v554_v1 = vsel %vm538_vm6, %v523_v56, %v546_v58 }
 0x3b6   :  { %v527_v2 = vadd.f32 %v526_v63, %v458_v61  ;;  %v528_v3 = vpop.f32.mrb[13].mxu1  ;;  %v564_v4 = vpack.c.bf16 %v554_v1, %v552_v0  ;;  %v917_v0 = vld [vmem:[%s1283_s12] sm:$0xff]   ;;  %v918_v1 = vld [vmem:[%s1283_s12 + $0x8] sm:$0xff]   ;;  %s984_s12 = smov [#allocation2]  }
 0x3b7   :  { %v529_v6 = vadd.f32 %v528_v3, %v458_v61  ;;  %v530_v8 = vpop.f32.mrb[14].mxu1  ;;  %s854_s0 = sshll.u32 %s984_s12, 4  ;;  %s855_s0 = int_to_ptr.vmem [resolvable:$true] %s854_s0 }
 0x3b8   :  { %v547_v9 = vmul.f32 0.2, %v527_v2  ;;  %v531_v10 = vadd.f32 %v530_v8, %v463_v5  ;;  %v532_v11 = vpop.f32.mrb[15].mxu1  ;;  %607 = vmatprep.subr.bf16.mxu0 %v564_v4  ;;  %vm539_vm7 = vcmp.ge.f32.partialorder %v527_v2, 0.0  ;;  %s959_s24 = scalar_lea.vmem %s855_s0, 1024  ;;  %p964_p1 = scmp.lt.s32.totalorder %s855_s0, %s855_s0 }
 0x3b9   :  { %v548_v12 = vmul.f32 0.2, %v529_v6  ;;  %v533_v13 = vadd.f32 %v532_v11, %v463_v5  ;;  %608 = vmatpush1.bf16.msra.mxu0 %v563_v62  ;;  %vm540_vm8 = vcmp.ge.f32.partialorder %v529_v6, 0.0  ;;  %p960_p0 = scmp.ne.s32.totalorder %s855_s0, %s959_s24  ;;  %p965_p2 = scmp.lt.s32.totalorder %s959_s24, %s959_s24 }
 0x3ba   :  { %vm541_vm9 = vcmp.ge.f32.partialorder %v531_v10, 0.0  ;;  %v549_v14 = vmul.f32 0.2, %v531_v10  ;;  %v555_v16 = vsel %vm539_vm7, %v527_v2, %v547_v9  ;;  %v699_v2 = vpop.permute.xlu0 %698 }
 0x3bb   :  { %vm542_vm10 = vcmp.ge.f32.partialorder %v533_v13, 0.0  ;;  %v550_v15 = vmul.f32 0.2, %v533_v13  ;;  %v556_v19 = vsel %vm540_vm8, %v529_v6, %v548_v12  ;;  %v704_v6 = vpop.permute.xlu1 %703  ;;  %p966_p3 = por %p965_p2, %p964_p1 }
 0x3bc   :  { %v557_v17 = vsel %vm541_vm9, %v531_v10, %v549_v14 }
 0x3bd   :  { %v565_v18 = vpack.c.bf16 %v557_v17, %v555_v16  ;;  %v558_v20 = vsel %vm542_vm10, %v533_v13, %v550_v15  ;;  %p967_p4 = pnand %p966_p3, %p960_p0 }
 0x3be   :  { %v566_v21 = vpack.c.bf16 %v558_v20, %v556_v19  ;;  %v709_v16 = vpop.permute.xlu0 %708 }
 0x3bf   :  { %v714_v20 = vpop.permute.xlu1 %713 }
 0x3c0   :  { %609 = vmatprep.subr.bf16.mxu0 %v566_v21 }
 0x3c1   :  { %610 = vmatpush1.bf16.msra.mxu0 %v565_v18 }
 0x3c4   :  { %887 = vmatmul.mubr.msk.bf16.vlgmr.msra.gmra.mrb[16].mxu0 %vm101_vm0, %v915_v22 }
 0x3c5   :  { %649 = vmatprep.mubr.bf16.mxu0 %v983_v7 }
 0x3cc   :  { %888 = vmatmul.mubr.msk.bf16.gmra.mrb[20].mxu0 %vm101_vm0, %v916_v23 }
 0x497   :  { %v641_v25 = vpop.f32.mrb[16].mxu0 }
 0x498   :  { %v642_v26 = vadd.f32 %v641_v25, %v574_v24  ;;  %v643_v27 = vpop.f32.mrb[17].mxu0 }
 0x499   :  { %v644_v29 = vadd.f32 %v643_v27, %v574_v24  ;;  %v645_v30 = vpop.f32.mrb[18].mxu0 }
 0x49a   :  { %v668_v31 = vmul.f32 0.2, %v642_v26  ;;  %v646_v32 = vadd.f32 %v645_v30, %v579_v28  ;;  %v647_v33 = vpop.f32.mrb[19].mxu0  ;;  %vm660_vm11 = vcmp.ge.f32.partialorder %v642_v26, 0.0 }
 0x49b   :  { %v669_v34 = vmul.f32 0.2, %v644_v29  ;;  %v648_v35 = vadd.f32 %v647_v33, %v579_v28  ;;  %vm661_vm12 = vcmp.ge.f32.partialorder %v644_v29, 0.0 }
 0x49c   :  { %vm662_vm13 = vcmp.ge.f32.partialorder %v646_v32, 0.0  ;;  %v670_v36 = vmul.f32 0.2, %v646_v32  ;;  %v676_v38 = vsel %vm660_vm11, %v642_v26, %v668_v31 }
 0x49d   :  { %vm663_vm14 = vcmp.ge.f32.partialorder %v648_v35, 0.0  ;;  %v671_v37 = vmul.f32 0.2, %v648_v35  ;;  %v677_v43 = vsel %vm661_vm12, %v644_v29, %v669_v34 }
 0x49e   :  { %v678_v39 = vsel %vm662_vm13, %v646_v32, %v670_v36 }
 0x49f   :  { %v688_v41 = vpack.c.bf16 %v678_v39, %v676_v38  ;;  %v651_v42 = vpop.f32.mrb[20].mxu0  ;;  %v679_v44 = vsel %vm663_vm14, %v648_v35, %v671_v37 }
 0x4a0   :  { %v652_v45 = vadd.f32 %v651_v42, %v584_v40  ;;  %v653_v46 = vpop.f32.mrb[21].mxu0  ;;  %v689_v47 = vpack.c.bf16 %v679_v44, %v677_v43 }
 0x4a1   :  { %v654_v49 = vadd.f32 %v653_v46, %v584_v40  ;;  %v655_v50 = vpop.f32.mrb[22].mxu0 }
 0x4a2   :  { %v672_v51 = vmul.f32 0.2, %v652_v45  ;;  %v656_v52 = vadd.f32 %v655_v50, %v589_v48  ;;  %v657_v53 = vpop.f32.mrb[23].mxu0  ;;  %732 = vmatprep.subr.bf16.mxu1 %v689_v47  ;;  %vm664_vm15 = vcmp.ge.f32.partialorder %v652_v45, 0.0 }
 0x4a3   :  { %v673_v54 = vmul.f32 0.2, %v654_v49  ;;  %v658_v55 = vadd.f32 %v657_v53, %v589_v48  ;;  %733 = vmatpush1.bf16.msra.mxu1 %v688_v41  ;;  %vm665_vm1 = vcmp.ge.f32.partialorder %v654_v49, 0.0 }
 0x4a4   :  { %vm666_vm2 = vcmp.ge.f32.partialorder %v656_v52, 0.0  ;;  %v674_v56 = vmul.f32 0.2, %v656_v52  ;;  %v680_v58 = vsel %vm664_vm15, %v652_v45, %v672_v51 }
 0x4a5   :  { %vm667_vm3 = vcmp.ge.f32.partialorder %v658_v55, 0.0  ;;  %v675_v57 = vmul.f32 0.2, %v658_v55  ;;  %v681_v61 = vsel %vm665_vm1, %v654_v49, %v673_v54 }
 0x4a6   :  { %v682_v59 = vsel %vm666_vm2, %v656_v52, %v674_v56 }
 0x4a7   :  { %v690_v60 = vpack.c.bf16 %v682_v59, %v680_v58  ;;  %v683_v62 = vsel %vm667_vm3, %v658_v55, %v675_v57 }
 0x4a8   :  { %v691_v63 = vpack.c.bf16 %v683_v62, %v681_v61 }
 0x4aa   :  { %734 = vmatprep.subr.bf16.mxu1 %v691_v63 }
 0x4ab   :  { %735 = vmatpush1.bf16.msra.mxu1 %v690_v60 }
 0x4ae   :  { %891 = vmatmul.mubr.msk.bf16.vlgmr.msra.gmra.mrb[16].mxu1 %vm101_vm0, %v917_v0 }
 0x4af   :  { %774 = vmatprep.mubr.bf16.mxu1 %v983_v7 }
 0x4b6   :  { %892 = vmatmul.mubr.msk.bf16.gmra.mrb[20].mxu1 %vm101_vm0, %v918_v1 }
 0x581   :  { %v766_v3 = vpop.f32.mrb[16].mxu1 }
 0x582   :  { %v767_v4 = vadd.f32 %v766_v3, %v699_v2  ;;  %v768_v5 = vpop.f32.mrb[17].mxu1 }
 0x583   :  { %v769_v8 = vadd.f32 %v768_v5, %v699_v2  ;;  %v770_v9 = vpop.f32.mrb[18].mxu1 }
 0x584   :  { %v893_v10 = vmul.f32 -1.442695, %v767_v4  ;;  %v771_v11 = vadd.f32 %v770_v9, %v704_v6  ;;  %v772_v12 = vpop.f32.mrb[19].mxu1 }
 0x585   :  { %v894_v13 = vmul.f32 -1.442695, %v769_v8  ;;  %v773_v14 = vadd.f32 %v772_v12, %v704_v6 }
 0x586   :  { %927 = vpow2.f32 %v893_v10  ;;  %v895_v7 = vmul.f32 -1.442695, %v771_v11 }
 0x587   :  { %929 = vpow2.f32 %v894_v13  ;;  %v896_v15 = vmul.f32 -1.442695, %v773_v14 }
 0x588   :  { %931 = vpow2.f32 %v895_v7 }
 0x589   :  { %933 = vpow2.f32 %v896_v15  ;;  %v776_v17 = vpop.f32.mrb[20].mxu1 }
 0x58a   :  { %v777_v18 = vadd.f32 %v776_v17, %v709_v16  ;;  %v778_v19 = vpop.f32.mrb[21].mxu1 }
 0x58b   :  { %v779_v21 = vadd.f32 %v778_v19, %v709_v16  ;;  %v780_v22 = vpop.f32.mrb[22].mxu1 }
 0x58c   :  { %v897_v23 = vmul.f32 -1.442695, %v777_v18  ;;  %v781_v24 = vadd.f32 %v780_v22, %v714_v20  ;;  %v782_v25 = vpop.f32.mrb[23].mxu1 }
 0x58d   :  { %v898_v26 = vmul.f32 -1.442695, %v779_v21  ;;  %v783_v27 = vadd.f32 %v782_v25, %v714_v20 }
 0x58e   :  { %935 = vpow2.f32 %v897_v23  ;;  %v899_v28 = vmul.f32 -1.442695, %v781_v24 }
 0x58f   :  { %937 = vpow2.f32 %v898_v26  ;;  %v900_v29 = vmul.f32 -1.442695, %v783_v27 }
 0x590   :  { %v928_v30 = vpop.eup %927  ;;  %939 = vpow2.f32 %v899_v28 }
 0x591   :  { %v930_v31 = vpop.eup %929  ;;  %v809_v32 = vadd.f32 1.0, %v928_v30  ;;  %941 = vpow2.f32 %v900_v29 }
 0x592   :  { %v932_v33 = vpop.eup %931  ;;  %v810_v34 = vadd.f32 1.0, %v930_v31 }
 0x593   :  { %v934_v35 = vpop.eup %933  ;;  %943 = vrcp.f32 %v809_v32  ;;  %v811_v36 = vadd.f32 1.0, %v932_v33 }
 0x594   :  { %945 = vrcp.f32 %v810_v34  ;;  %v812_v37 = vadd.f32 1.0, %v934_v35 }
 0x595   :  { %947 = vrcp.f32 %v811_v36 }
 0x596   :  { %949 = vrcp.f32 %v812_v37 }
 0x598   :  { %v936_v38 = vpop.eup %935 }
 0x599   :  { %v938_v39 = vpop.eup %937  ;;  %v813_v40 = vadd.f32 1.0, %v936_v38 }
 0x59a   :  { %v940_v41 = vpop.eup %939  ;;  %v814_v42 = vadd.f32 1.0, %v938_v39 }
 0x59b   :  { %v942_v43 = vpop.eup %941  ;;  %951 = vrcp.f32 %v813_v40  ;;  %v815_v44 = vadd.f32 1.0, %v940_v41 }
 0x59c   :  { %953 = vrcp.f32 %v814_v42  ;;  %v816_v45 = vadd.f32 1.0, %v942_v43 }
 0x59d   :  { %v944_v46 = vpop.eup %943  ;;  %955 = vrcp.f32 %v815_v44 }
 0x59e   :  { %v946_v47 = vpop.eup %945  ;;  %833 = vst [vmem:[#allocation2] sm:$0xff] %v944_v46  ;;  %957 = vrcp.f32 %v816_v45 }
 0x59f   :  { %v948_v48 = vpop.eup %947  ;;  %834 = vst [vmem:[#allocation2 + $0x8] sm:$0xff] %v946_v47 }
 0x5a0   :  { %v950_v49 = vpop.eup %949  ;;  %835 = vst [vmem:[#allocation2 + $0x10] sm:$0xff] %v948_v48 }
 0x5a1   :  { %836 = vst [vmem:[#allocation2 + $0x18] sm:$0xff] %v950_v49 }
 0x5a5   :  { %v952_v50 = vpop.eup %951 }
 0x5a6   :  { %v954_v51 = vpop.eup %953  ;;  %837 = vst [vmem:[#allocation2 + $0x20] sm:$0xff] %v952_v50 }
 0x5a7   :  { %v956_v52 = vpop.eup %955  ;;  %838 = vst [vmem:[#allocation2 + $0x28] sm:$0xff] %v954_v51 }
 0x5a8   :  { %v958_v53 = vpop.eup %957  ;;  %839 = vst [vmem:[#allocation2 + $0x30] sm:$0xff] %v956_v52 }
 0x5a9   :  { %840 = vst [vmem:[#allocation2 + $0x38] sm:$0xff] %v958_v53 }
 0x5aa   :  { %970 = shalt.err (!%p967_p4)
}
 0x5ab   :  { %s971_s5 = scalar_lea.hbm %s1285_s14, 1024 }
 0x5ac   :  { %p972_p5 = scmp.ne.s32.totalorder %s1285_s14, %s971_s5  ;;  %p975_p6 = scmp.lt.u32.totalorder %s971_s5, %s1285_s14 }
 0x5ae   :  { %p977_p7 = pnand %p975_p6, %p972_p5 }
 0x5b0   :  { %980 = shalt.err (!%p977_p7)
}
 0x5b1   :  { %s985_s29 = smov 256   ;;  %s986_s11 = smov 16  }
 0x5b2   :  { %860 = dma.vmem_to_hbm [thread:$0]  %s855_s0, 1024, %s1285_s14, [#allocation3], %s985_s29, %s985_s29, %s986_s11  }
 0x5b3   :  { %981 = dma.done.wait [#allocation3], 1024  }
 0x5b4   :  { %982 = vsyncadd [#allocation3], 4294966272 }
 0x5b5   :  { %868 = vsyncpa [#allocation3], 1 }

</bundles_post_ra>
